<compile_context>
chip_gen: v6e
topology: v6e:2x2x1
jax: 0.10.0
libtpu: 0.0.40
codegen_flags: <defaults>
</compile_context>

<pallas_src>
import functools

import jax
import jax.numpy as jnp
import numpy as np
from jax import lax
from jax.experimental import pallas as pl
from jax.experimental.pallas import tpu as pltpu


# ------------------------------ fused kernel -------------------------------- #
def make_contrast_kernel(tau, lam, n, hidden, d_out):
    inv_tau = 1.0 / float(tau)
    lam = float(lam)
    eps = 1e-8

    def kernel(z_ref, pos_ref, w1_ref, w2_ref, b_ref, loss_ref, p_ref):
        # -------- projection MLP on the stacked [2N, H] batch (za rows 0..N-1) -------- #
        z = z_ref[...]                                                         # [2N, H]
        b1 = b_ref[0:1, :hidden]                                               # [1, H]
        b2 = b_ref[1:2, :d_out]                                                # [1, OUT]

        h = jnp.dot(z, w1_ref[...], preferred_element_type=jnp.float32) + b1
        # ELU(alpha=1.0), matches reference (no max-subtraction / expm1 deviation).
        h = jnp.where(h > 0.0, h, jnp.exp(h) - 1.0)
        p = jnp.dot(h, w2_ref[...], preferred_element_type=jnp.float32) + b2   # [2N, OUT]

        # One lane-dense full-block store of the stacked projections; the module's
        # last-dim concat is done in the XLA wrapper.
        p_ref[...] = p

        pa = p[:n, :]                                                          # [N, OUT]
        pb = p[n:, :]                                                          # [N, OUT]

        # ------------- cosine similarity: rsqrt norms, 1/tau folded into qa ---------- #
        inv_na = lax.rsqrt(jnp.sum(pa * pa, axis=-1, keepdims=True))           # [N, 1]
        inv_nb = lax.rsqrt(jnp.sum(pb * pb, axis=-1, keepdims=True))           # [N, 1]
        qa = pa * (inv_na * inv_tau)
        qb = pb * inv_nb

        dn = (((1,), (1,)), ((), ()))  # contract last dims: X @ Y.T without a transpose
        # a->b similarity and b->a similarity (== s_ab.T) from two tiny MXU dots,
        # so no [N,N] transpose and no pos_t are needed anywhere.
        s_ab = jnp.exp(lax.dot_general(qa, qb, dn, preferred_element_type=jnp.float32))  # [N,N]
        s_ba = jnp.exp(lax.dot_general(qb, qa, dn, preferred_element_type=jnp.float32))  # [N,N]

        pos = pos_ref[...]
        row_a = jnp.sum(s_ab, axis=1, keepdims=True)                           # [N, 1]
        num_a = jnp.sum(s_ab * pos, axis=1, keepdims=True)                     # [N, 1]
        row_b = jnp.sum(s_ba, axis=1, keepdims=True)                           # [N, 1]
        num_b = jnp.sum(s_ba * pos, axis=1, keepdims=True)                     # [N, 1]

        # -log( num / (sum + eps) ) == log(sum + eps) - log(num)   (exact split)
        lori_a = jnp.mean(jnp.log(row_a + eps) - jnp.log(num_a))
        lori_b = jnp.mean(jnp.log(row_b + eps) - jnp.log(num_b))

        loss_ref[0] = lam * lori_a + (1.0 - lam) * lori_b

    return kernel


# --------------------------------- wrapper ---------------------------------- #
@functools.partial(jax.jit, static_argnames=("tau", "lam"))
def contrast_forward(za, zb, pos, w1, b1, w2, b2, tau, lam):
    n, hidden = za.shape
    d_out = w2.shape[1]

    # Pre-pack inputs to minimize DMA descriptor count for this latency-bound kernel:
    #   z        : [2N, H]  (za rows 0..N-1, zb rows N..2N-1)
    #   b_packed : [2, max(H, OUT)] (row 0 = b1, row 1 = b2 zero-padded) -> prefix slices in-kernel
    z = jnp.concatenate([za, zb], axis=0)
    bw = max(hidden, d_out)
    b_packed = jnp.zeros((2, bw), jnp.float32)
    b_packed = b_packed.at[0, :hidden].set(b1.reshape(-1))
    b_packed = b_packed.at[1, :d_out].set(b2.reshape(-1))

    loss, p = pl.pallas_call(
        make_contrast_kernel(tau, lam, n, hidden, d_out),
        out_shape=(
            jax.ShapeDtypeStruct((1,), jnp.float32),            # scalar loss (SMEM, 1-D)
            jax.ShapeDtypeStruct((2 * n, d_out), jnp.float32),  # stacked projections
        ),
        out_specs=(
            pl.BlockSpec(memory_space=pltpu.MemorySpace.SMEM),
            pl.BlockSpec(memory_space=pltpu.MemorySpace.VMEM),
        ),
    )(z, pos, w1, w2, b_packed)

    # Module returns torch.cat((za_proj, zb_proj), 1): cheap last-dim concat in XLA.
    proj_cat = jnp.concatenate([p[:n], p[n:]], axis=1)
    return loss[0], proj_cat


# ----------------------------- pure-JAX reference --------------------------- #
def reference_forward(za, zb, pos, w1, b1, w2, b2, tau, lam):
    def proj(z):
        h = z @ w1 + b1
        h = jnp.where(h > 0.0, h, jnp.exp(h) - 1.0)  # ELU(alpha=1)
        return h @ w2 + b2

    za_p, zb_p = proj(za), proj(zb)
    na = jnp.linalg.norm(za_p, axis=-1, keepdims=True)
    nb = jnp.linalg.norm(zb_p, axis=-1, keepdims=True)
    s = jnp.exp((za_p @ zb_p.T) / (na @ nb.T) / tau)
    a2b = s / (jnp.sum(s, axis=1, keepdims=True) + 1e-8)
    lori_a = -jnp.mean(jnp.log(jnp.sum(a2b * pos, axis=-1)))
    st = s.T
    b2a = st / (jnp.sum(st, axis=1, keepdims=True) + 1e-8)
    lori_b = -jnp.mean(jnp.log(jnp.sum(b2a * pos, axis=-1)))
    return lam * lori_a + (1 - lam) * lori_b, jnp.concatenate([za_p, zb_p], axis=1)


# ------------------------------------ main ----------------------------------- #
if __name__ == "__main__":
    N, HIDDEN, OUT = 8, 32, 16
    TAU, LAM = 0.5, 0.5

    key = jax.random.PRNGKey(0)
    k = jax.random.split(key, 6)

    # Deterministic Xavier-normal init with gain=1.414 (as in the module's __init__).
    gain = 1.414
    std1 = gain * (2.0 / (HIDDEN + HIDDEN)) ** 0.5
    std2 = gain * (2.0 / (HIDDEN + OUT)) ** 0.5
    w1 = (jax.random.normal(k[0], (HIDDEN, HIDDEN)) * std1).astype(jnp.float32)  # [in, out]
    b1 = (jax.random.uniform(k[1], (1, HIDDEN), minval=-0.1, maxval=0.1)).astype(jnp.float32)
    w2 = (jax.random.normal(k[2], (HIDDEN, OUT)) * std2).astype(jnp.float32)     # [in, out]
    b2 = (jax.random.uniform(k[3], (1, OUT), minval=-0.1, maxval=0.1)).astype(jnp.float32)

    za = jax.random.normal(k[4], (N, HIDDEN), dtype=jnp.float32)
    zb = jax.random.normal(k[5], (N, HIDDEN), dtype=jnp.float32)
    # pos is a sparse matrix in PyTorch; build the dense positive mask directly.
    pos = jnp.eye(N, dtype=jnp.float32)

    loss, proj_cat = contrast_forward(za, zb, pos, w1, b1, w2, b2, TAU, LAM)
    loss = jax.block_until_ready(loss)
    proj_cat = jax.block_until_ready(proj_cat)

    ref_loss, ref_cat = reference_forward(za, zb, pos, w1, b1, w2, b2, TAU, LAM)
    np.testing.assert_allclose(np.asarray(loss), np.asarray(ref_loss), rtol=1e-4, atol=1e-5)
    np.testing.assert_allclose(np.asarray(proj_cat), np.asarray(ref_cat), rtol=1e-5, atol=1e-5)

    print("KERNEL_OK")
</pallas_src>

<mosaic_0001>
module attributes {stable_mosaic.version = 11 : i64} {
  func.func @kernel(%arg0: memref<16x32xf32, #tpu.memory_space<vmem>>, %arg1: memref<8x8xf32, #tpu.memory_space<vmem>>, %arg2: memref<32x32xf32, #tpu.memory_space<vmem>>, %arg3: memref<32x16xf32, #tpu.memory_space<vmem>>, %arg4: memref<2x32xf32, #tpu.memory_space<vmem>>, %arg5: memref<1xf32, #tpu.memory_space<smem>>, %arg6: memref<16x16xf32, #tpu.memory_space<vmem>>) attributes {dimension_semantics = [], scalar_prefetch = 0 : i64, scratch_operands = 0 : i64, tpu.core_type = #tpu.core_type<tc>} {
    %c0 = arith.constant 0 : index
    %c0_0 = arith.constant 0 : index
    %0 = vector.load %arg0[%c0, %c0_0] : memref<16x32xf32, #tpu.memory_space<vmem>>, vector<16x32xf32>
    %c0_1 = arith.constant 0 : index
    %c0_2 = arith.constant 0 : index
    %1 = vector.load %arg4[%c0_1, %c0_2] : memref<2x32xf32, #tpu.memory_space<vmem>>, vector<1x32xf32>
    %c1 = arith.constant 1 : index
    %c0_3 = arith.constant 0 : index
    %2 = vector.load %arg4[%c1, %c0_3] : memref<2x32xf32, #tpu.memory_space<vmem>>, vector<1x16xf32>
    %c0_4 = arith.constant 0 : index
    %c0_5 = arith.constant 0 : index
    %3 = vector.load %arg2[%c0_4, %c0_5] : memref<32x32xf32, #tpu.memory_space<vmem>>, vector<32x32xf32>
    %cst = arith.constant dense<0.000000e+00> : vector<16x32xf32>
    %4 = tpu.matmul %0, %3, %cst {dimension_numbers = #tpu.dot_dimension_numbers<[1], [0], [0], [1], [0, 0, 1, 1], [], []>} : vector<16x32xf32>, vector<32x32xf32>, vector<16x32xf32> -> vector<16x32xf32>
    %5 = vector.broadcast %1 : vector<1x32xf32> to vector<16x32xf32>
    %6 = arith.addf %4, %5 : vector<16x32xf32>
    %cst_6 = arith.constant 0.000000e+00 : f32
    %7 = vector.broadcast %cst_6 : f32 to vector<16x32xf32>
    %8 = arith.cmpf ogt, %6, %7 : vector<16x32xf32>
    %9 = math.exp %6 : vector<16x32xf32>
    %cst_7 = arith.constant 1.000000e+00 : f32
    %10 = vector.broadcast %cst_7 : f32 to vector<16x32xf32>
    %11 = arith.subf %9, %10 : vector<16x32xf32>
    %12 = arith.select %8, %6, %11 : vector<16x32xi1>, vector<16x32xf32>
    %c0_8 = arith.constant 0 : index
    %c0_9 = arith.constant 0 : index
    %13 = vector.load %arg3[%c0_8, %c0_9] : memref<32x16xf32, #tpu.memory_space<vmem>>, vector<32x16xf32>
    %cst_10 = arith.constant dense<0.000000e+00> : vector<16x16xf32>
    %14 = tpu.matmul %12, %13, %cst_10 {dimension_numbers = #tpu.dot_dimension_numbers<[1], [0], [0], [1], [0, 0, 1, 1], [], []>} : vector<16x32xf32>, vector<32x16xf32>, vector<16x16xf32> -> vector<16x16xf32>
    %15 = vector.broadcast %2 : vector<1x16xf32> to vector<16x16xf32>
    %16 = arith.addf %14, %15 : vector<16x16xf32>
    %c0_11 = arith.constant 0 : index
    %c0_12 = arith.constant 0 : index
    %17 = vector.load %arg6[%c0_11, %c0_12] : memref<16x16xf32, #tpu.memory_space<vmem>>, vector<16x16xf32>
    tpu.vector_store %arg6[%c0_11, %c0_12], %16 {strides = array<i32>} : memref<16x16xf32, #tpu.memory_space<vmem>>, vector<16x16xf32>,
    %18 = vector.extract_strided_slice %16 {offsets = [0, 0], sizes = [8, 16], strides = [1, 1]} : vector<16x16xf32> to vector<8x16xf32>
    %19 = vector.extract_strided_slice %16 {offsets = [8, 0], sizes = [8, 16], strides = [1, 1]} : vector<16x16xf32> to vector<8x16xf32>
    %20 = arith.mulf %18, %18 : vector<8x16xf32>
    %cst_13 = arith.constant dense<0.000000e+00> : vector<8xf32>
    %21 = vector.multi_reduction <add>, %20, %cst_13 [1] : vector<8x16xf32> to vector<8xf32>
    %22 = vector.shape_cast %21 : vector<8xf32> to vector<8x1xf32>
    %23 = math.rsqrt %22 : vector<8x1xf32>
    %24 = arith.mulf %19, %19 : vector<8x16xf32>
    %cst_14 = arith.constant dense<0.000000e+00> : vector<8xf32>
    %25 = vector.multi_reduction <add>, %24, %cst_14 [1] : vector<8x16xf32> to vector<8xf32>
    %26 = vector.shape_cast %25 : vector<8xf32> to vector<8x1xf32>
    %27 = math.rsqrt %26 : vector<8x1xf32>
    %cst_15 = arith.constant 2.000000e+00 : f32
    %28 = vector.broadcast %cst_15 : f32 to vector<8x1xf32>
    %29 = arith.mulf %23, %28 : vector<8x1xf32>
    %30 = vector.broadcast %29 : vector<8x1xf32> to vector<8x16xf32>
    %31 = arith.mulf %18, %30 : vector<8x16xf32>
    %32 = vector.broadcast %27 : vector<8x1xf32> to vector<8x16xf32>
    %33 = arith.mulf %19, %32 : vector<8x16xf32>
    %cst_16 = arith.constant dense<0.000000e+00> : vector<8x8xf32>
    %34 = tpu.matmul %31, %33, %cst_16 {dimension_numbers = #tpu.dot_dimension_numbers<[1], [1], [0], [0], [0, 0, 1, 0], [], []>} : vector<8x16xf32>, vector<8x16xf32>, vector<8x8xf32> -> vector<8x8xf32>
    %35 = math.exp %34 : vector<8x8xf32>
    %cst_17 = arith.constant dense<0.000000e+00> : vector<8x8xf32>
    %36 = tpu.matmul %33, %31, %cst_17 {dimension_numbers = #tpu.dot_dimension_numbers<[1], [1], [0], [0], [0, 0, 1, 0], [], []>} : vector<8x16xf32>, vector<8x16xf32>, vector<8x8xf32> -> vector<8x8xf32>
    %37 = math.exp %36 : vector<8x8xf32>
    %c0_18 = arith.constant 0 : index
    %c0_19 = arith.constant 0 : index
    %38 = vector.load %arg1[%c0_18, %c0_19] : memref<8x8xf32, #tpu.memory_space<vmem>>, vector<8x8xf32>
    %cst_20 = arith.constant dense<0.000000e+00> : vector<8xf32>
    %39 = vector.multi_reduction <add>, %35, %cst_20 [1] : vector<8x8xf32> to vector<8xf32>
    %40 = vector.shape_cast %39 : vector<8xf32> to vector<8x1xf32>
    %41 = arith.mulf %35, %38 : vector<8x8xf32>
    %cst_21 = arith.constant dense<0.000000e+00> : vector<8xf32>
    %42 = vector.multi_reduction <add>, %41, %cst_21 [1] : vector<8x8xf32> to vector<8xf32>
    %43 = vector.shape_cast %42 : vector<8xf32> to vector<8x1xf32>
    %cst_22 = arith.constant dense<0.000000e+00> : vector<8xf32>
    %44 = vector.multi_reduction <add>, %37, %cst_22 [1] : vector<8x8xf32> to vector<8xf32>
    %45 = vector.shape_cast %44 : vector<8xf32> to vector<8x1xf32>
    %46 = arith.mulf %37, %38 : vector<8x8xf32>
    %cst_23 = arith.constant dense<0.000000e+00> : vector<8xf32>
    %47 = vector.multi_reduction <add>, %46, %cst_23 [1] : vector<8x8xf32> to vector<8xf32>
    %48 = vector.shape_cast %47 : vector<8xf32> to vector<8x1xf32>
    %cst_24 = arith.constant 9.99999993E-9 : f32
    %49 = vector.broadcast %cst_24 : f32 to vector<8x1xf32>
    %50 = arith.addf %40, %49 : vector<8x1xf32>
    %51 = math.log %50 : vector<8x1xf32>
    %52 = math.log %43 : vector<8x1xf32>
    %53 = arith.subf %51, %52 : vector<8x1xf32>
    %54 = vector.shape_cast %53 : vector<8x1xf32> to vector<1x8x1xf32>
    %cst_25 = arith.constant dense<0.000000e+00> : vector<1xf32>
    %55 = vector.multi_reduction <add>, %54, %cst_25 [1, 2] : vector<1x8x1xf32> to vector<1xf32>
    %56 = vector.shape_cast %55 : vector<1xf32> to vector<1x1x1xf32>
    %57 = vector.extract %56[0, 0, 0] : f32 from vector<1x1x1xf32>
    %cst_26 = arith.constant 8.000000e+00 : f32
    %58 = arith.divf %57, %cst_26 : f32
    %cst_27 = arith.constant 9.99999993E-9 : f32
    %59 = vector.broadcast %cst_27 : f32 to vector<8x1xf32>
    %60 = arith.addf %45, %59 : vector<8x1xf32>
    %61 = math.log %60 : vector<8x1xf32>
    %62 = math.log %48 : vector<8x1xf32>
    %63 = arith.subf %61, %62 : vector<8x1xf32>
    %64 = vector.shape_cast %63 : vector<8x1xf32> to vector<1x8x1xf32>
    %cst_28 = arith.constant dense<0.000000e+00> : vector<1xf32>
    %65 = vector.multi_reduction <add>, %64, %cst_28 [1, 2] : vector<1x8x1xf32> to vector<1xf32>
    %66 = vector.shape_cast %65 : vector<1xf32> to vector<1x1x1xf32>
    %67 = vector.extract %66[0, 0, 0] : f32 from vector<1x1x1xf32>
    %cst_29 = arith.constant 8.000000e+00 : f32
    %68 = arith.divf %67, %cst_29 : f32
    %cst_30 = arith.constant 5.000000e-01 : f32
    %69 = arith.mulf %cst_30, %58 : f32
    %cst_31 = arith.constant 5.000000e-01 : f32
    %70 = arith.mulf %cst_31, %68 : f32
    %71 = arith.addf %69, %70 : f32
    %c0_32 = arith.constant 0 : index
    %72 = memref.load %arg5[%c0_32] : memref<1xf32, #tpu.memory_space<smem>>
    memref.store %71, %arg5[%c0_32] : memref<1xf32, #tpu.memory_space<smem>>
    return
  }
}

</mosaic_0001>

<bundles_post_ra>
// kernel: contrast_forward.1
= control target key start
LH: loop header
LB: loop body
LE: loop exit
PB: predicated region body
PF: predicated region fallthrough
CT: control target
= control target key end

     0   :  { %vm35_vm0 = vcmask 261120   ;;  %s654_s0 = inlined_call_operand.vmem [shape: f32[16,32], index: 0, kind: input, shape index: {}]   ;;  %s655_s1 = inlined_call_operand.vmem [shape: f32[8,8], index: 1, kind: input, shape index: {}]   ;;  %s656_s2 = inlined_call_operand.vmem [shape: f32[32,32], index: 2, kind: input, shape index: {}]   ;;  %s657_s3 = inlined_call_operand.vmem [shape: f32[32,16], index: 3, kind: input, shape index: {}]   ;;  %s658_s4 = inlined_call_operand.vmem [shape: f32[2,32], index: 4, kind: input, shape index: {}]   ;;  %s659_s5 = inlined_call_operand.hbm [shape: f32[1], index: 5, kind: output, shape index: {0}]   ;;  %s660_s6 = inlined_call_operand.vmem [shape: f32[16,16], index: 6, kind: output, shape index: {1}]  }
   0x1   :  { %v30_v0 = vld [vmem:[%s656_s2 + $0x18] sm:$0xff]  ;;  %v29_v1 = vld [vmem:[%s656_s2 + $0x10] sm:$0xff]  ;;  %v23_v2 = vld [vmem:[%s654_s0] sm:$0xff] }
   0x2   :  { %487 = vmatprep.subr.mxu0 %v30_v0  ;;  %v28_v3 = vld [vmem:[%s656_s2 + $0x8] sm:$0xff]  ;;  %495 = vmatprep.mubr.msk.f32.mxu0 %vm35_vm0, %v23_v2 }
   0x3   :  { %488 = vmatpush3.msra.mxu0 %v30_v0 }
   0x4   :  { %12 = vsyncpa [#allocation3], 0  ;;  %489 = vmatprep.subr.mxu0 %v29_v1  ;;  %v27_v4 = vld [vmem:[%s656_s2] sm:$0xff]  ;;  %v24_v5 = vld [vmem:[%s654_s0 + $0x8] sm:$0xff]  ;;  %vm216_vm3 = vcmask 130048   ;;  %v556_v32 = vmov 0.0  }
   0x5   :  { %490 = vmatpush3.msra.mxu0 %v29_v1  ;;  %v130_v6 = vld [vmem:[%s657_s3 + $0x18] sm:$0xff]  ;;  %v129_v7 = vld [vmem:[%s657_s3 + $0x10] sm:$0xff]  ;;  %v128_v8 = vld [vmem:[%s657_s3 + $0x8] sm:$0xff]  ;;  %vm557_vm4 = vmmov 0   ;;  %vm383_vm5 = vcmask 64512   ;;  %vm404_vm6 = vcmask 7168  }
   0x6   :  { %491 = vmatprep.subr.mxu0 %v28_v3  ;;  %498 = vmatprep.subr.mxu1 %v130_v6  ;;  %v127_v9 = vld [vmem:[%s657_s3] sm:$0xff]  ;;  %s558_s28 = smov [#allocation2]  }
   0x7   :  { %492 = vmatpush3.msra.mxu0 %v28_v3  ;;  %499 = vmatpush3.msra.mxu1 %v130_v6  ;;  %v459_v10 = vld [vmem:[%s658_s4] ss:$0 sm:$0xff]  ;;  %v464_v23 = vld [vmem:[%s658_s4 + $0x1] ss:$0 sm:$0xff] }
   0x8   :  { %493 = vmatprep.subr.mxu0 %v27_v4  ;;  %500 = vmatprep.subr.mxu1 %v129_v7  ;;  %v382_v47 = vld [vmem:[%s655_s1] sm:$0xff] }
   0x9   :  { %494 = vmatpush3.msra.mxu0 %v27_v4  ;;  %501 = vmatpush3.msra.mxu1 %v129_v7 }
   0xa   :  { %496 = vmatmul.mubr.msk.f32.vlgmr.msra.gmra.mxu0 %vm35_vm0, %v24_v5  ;;  %502 = vmatprep.subr.mxu1 %v128_v8 }
   0xb   :  { %503 = vmatpush3.msra.mxu1 %v128_v8  ;;  %509 = vmatprep.subr.mxu0 %v556_v32 }
   0xc   :  { %504 = vmatprep.subr.mxu1 %v127_v9  ;;  %511 = vmatprep.mubr.msk.f32.mxu0 %vm557_vm4, %v556_v32 }
   0xd   :  { %505 = vmatpush3.msra.mxu1 %v127_v9 }
   0xe   :  { %514 = vmatprep.subr.mxu1 %v556_v32 }
  0xca   :  { %v497_v11 = vpop.f32.mrf.mxu0 }
  0xcb   :  { %v114_v12 = vadd.f32 %v497_v11, %v459_v10 }
  0xcc   :  { %v108_v13 = vpop.f32.mrf.mxu0 }
  0xcd   :  { %v121_v14 = vmul.f32 1.442695, %v114_v12  ;;  %v109_v15 = vadd.f32 %v459_v10, %v108_v13  ;;  %vm118_vm2 = vcmp.gt.f32.partialorder %v114_v12, 0.0 }
  0xcf   :  { %526 = vpow2.f32 %v121_v14  ;;  %v119_v16 = vmul.f32 1.442695, %v109_v15  ;;  %vm117_vm1 = vcmp.gt.f32.partialorder %v109_v15, 0.0 }
  0xd1   :  { %528 = vpow2.f32 %v119_v16 }
  0xdc   :  { %v527_v17 = vpop.eup %526 }
  0xdd   :  { %v463_v19 = vadd.f32 -1.0, %v527_v17 }
  0xde   :  { %v529_v18 = vpop.eup %528 }
  0xdf   :  { %v462_v20 = vadd.f32 -1.0, %v529_v18  ;;  %v126_v22 = vsel %vm118_vm2, %v114_v12, %v463_v19 }
  0xe1   :  { %v125_v21 = vsel %vm117_vm1, %v109_v15, %v462_v20 }
  0xe2   :  { %506 = vmatprep.mubr.msk.f32.mxu1 %vm35_vm0, %v125_v21 }
  0xe3   :  { %507 = vmatmul.mubr.msk.f32.vlgmr.msra.gmra.mxu1 %vm35_vm0, %v126_v22 }
  0xe4   :  { %516 = vmatprep.mubr.msk.f32.mxu1 %vm557_vm4, %v556_v32 }
 0x1a3   :  { %v508_v24 = vpop.f32.mrf.mxu1 }
 0x1a4   :  { %v213_v25 = vadd.f32 %v508_v24, %v464_v23 }
 0x1a5   :  { %v207_v26 = vpop.f32.mrf.mxu1 }
 0x1a6   :  { %218 = vst.msk [vmem:[%s660_s6 + $0x8] sm:$0xff] %vm216_vm3, %v213_v25  ;;  %v208_v27 = vadd.f32 %v464_v23, %v207_v26  ;;  %v224_v30 = vmul.f32 %v213_v25, %v213_v25 }
 0x1a8   :  { %217 = vst.msk [vmem:[%s660_s6] sm:$0xff] %vm216_vm3, %v208_v27  ;;  %v219_v28 = vmul.f32 %v208_v27, %v208_v27  ;;  %v225_v31 = vsel %vm216_vm3, %v224_v30, 0.0 }
 0x1aa   :  { %v220_v29 = vsel %vm216_vm3, %v219_v28, 0.0 }
 0x1ab   :  { %221 = vadd.xlane.f32.xlu0 %v220_v29 }
 0x1af   :  { %226 = vadd.xlane.f32.xlu0 %v225_v31 }
 0x234   :  { %v222_v33 = vpop.xlane.xlu0 %221 }
 0x235   :  { %530 = vrsqrt.f32 %v222_v33 }
 0x238   :  { %v227_v34 = vpop.xlane.xlu0 %226 }
 0x239   :  { %532 = vrsqrt.f32 %v227_v34 }
 0x242   :  { %v531_v35 = vpop.eup %530 }
 0x243   :  { %v229_v36 = vmul.f32 2.0, %v531_v35 }
 0x245   :  { %v230_v37 = vmul.f32 %v229_v36, %v208_v27 }
 0x246   :  { %v533_v38 = vpop.eup %532 }
 0x247   :  { %515 = vmatpush3.xpose.msk.msra.mxu1 %vm216_vm3, %v230_v37  ;;  %v231_v39 = vmul.f32 %v533_v38, %v213_v25 }
 0x249   :  { %510 = vmatpush3.xpose.msk.msra.mxu0 %vm216_vm3, %v231_v39 }
 0x24a   :  { %517 = vmatmul.mubr.msk.f32.vlgmr.msra.gmra.mxu1 %vm216_vm3, %v231_v39 }
 0x24c   :  { %512 = vmatmul.mubr.msk.f32.vlgmr.msra.gmra.mxu0 %vm216_vm3, %v230_v37 }
 0x30a   :  { %v376_v40 = vpop.f32.mrf.mxu1 }
 0x30b   :  { %v380_v43 = vmul.f32 1.442695, %v376_v40 }
 0x30c   :  { %v304_v41 = vpop.f32.mrf.mxu0  ;;  %v518_v42 = vpop.f32.mrf.mxu1 }
 0x30d   :  { %v308_v44 = vmul.f32 1.442695, %v304_v41 }
 0x30e   :  { %v513_v45 = vpop.f32.mrf.mxu0 }
 0x30f   :  { %534 = vpow2.f32 %v308_v44 }
 0x310   :  { %536 = vpow2.f32 %v380_v43 }
 0x31c   :  { %v535_v46 = vpop.eup %534 }
 0x31d   :  { %v384_v48 = vsel %vm383_vm5, %v535_v46, 0.0  ;;  %v387_v49 = vmul.f32 %v535_v46, %v382_v47  ;;  %v537_v50 = vpop.eup %536 }
 0x31e   :  { %385 = vadd.xlane.f32.xlu1 %v384_v48  ;;  %v391_v52 = vsel %vm383_vm5, %v537_v50, 0.0  ;;  %v394_v53 = vmul.f32 %v537_v50, %v382_v47 }
 0x31f   :  { %v388_v51 = vsel %vm383_vm5, %v387_v49, 0.0 }
 0x320   :  { %389 = vadd.xlane.f32.xlu0 %v388_v51  ;;  %v395_v54 = vsel %vm383_vm5, %v394_v53, 0.0 }
 0x322   :  { %392 = vadd.xlane.f32.xlu1 %v391_v52 }
 0x326   :  { %396 = vadd.xlane.f32.xlu1 %v395_v54 }
 0x3a7   :  { %v386_v55 = vpop.xlane.xlu1 %385 }
 0x3a8   :  { %v398_v56 = vadd.f32 1e-08, %v386_v55 }
 0x3a9   :  { %v390_v57 = vpop.xlane.xlu0 %389 }
 0x3aa   :  { %538 = vlog2.f32 %v398_v56 }
 0x3ab   :  { %540 = vlog2.f32 %v390_v57  ;;  %v393_v58 = vpop.xlane.xlu1 %392 }
 0x3ac   :  { %v418_v59 = vadd.f32 1e-08, %v393_v58 }
 0x3ae   :  { %542 = vlog2.f32 %v418_v59 }
 0x3af   :  { %v397_v60 = vpop.xlane.xlu1 %396 }
 0x3b0   :  { %544 = vlog2.f32 %v397_v60 }
 0x3b7   :  { %v539_v61 = vpop.eup %538 }
 0x3b8   :  { %v541_v62 = vpop.eup %540  ;;  %v400_v63 = vmul.f32 0.6931472, %v539_v61 }
 0x3b9   :  { %v402_v0 = vmul.f32 0.6931472, %v541_v62 }
 0x3bb   :  { %v543_v1 = vpop.eup %542  ;;  %v403_v2 = vsub.f32 %v400_v63, %v402_v0 }
 0x3bc   :  { %v420_v6 = vmul.f32 0.6931472, %v543_v1 }
 0x3bd   :  { %v545_v3 = vpop.eup %544  ;;  %v405_v4 = vsel %vm404_vm6, %v403_v2, 0.0 }
 0x3be   :  { %v422_v5 = vmul.f32 0.6931472, %v545_v3  ;;  %406 = vadd.xlane.f32.xlu0 %v405_v4 }
 0x3c0   :  { %v423_v7 = vsub.f32 %v420_v6, %v422_v5 }
 0x3c2   :  { %v424_v8 = vsel %vm404_vm6, %v423_v7, 0.0 }
 0x3c3   :  { %425 = vadd.xlane.f32.xlu1 %v424_v8 }
 0x447   :  { %v407_v9 = vpop.xlane.xlu0 %406 }
 0x448   :  { %v408_v10 = vrot.slane %v407_v9, 4 }
 0x44a   :  { %v409_v11 = vadd.f32 %v408_v10, %v407_v9 }
 0x44c   :  { %v410_v12 = vrot.slane %v409_v11, 2  ;;  %v426_v13 = vpop.xlane.xlu1 %425 }
 0x44d   :  { %v427_v14 = vrot.slane %v426_v13, 4 }
 0x44e   :  { %v411_v15 = vadd.f32 %v410_v12, %v409_v11 }
 0x44f   :  { %v428_v16 = vadd.f32 %v427_v14, %v426_v13 }
 0x450   :  { %v412_v17 = vrot.slane %v411_v15, 1 }
 0x451   :  { %v429_v18 = vrot.slane %v428_v16, 2 }
 0x452   :  { %v413_v19 = vadd.f32 %v412_v17, %v411_v15 }
 0x453   :  { %v430_v20 = vadd.f32 %v429_v18, %v428_v16 }
 0x454   :  { %519 = vpush %v413_v19 }
 0x455   :  { %v431_v21 = vrot.slane %v430_v20, 1 }
 0x457   :  { %v432_v22 = vadd.f32 %v431_v21, %v430_v20 }
 0x459   :  { %521 = vpush %v432_v22 }
 0x485   :  { %s520_s1 = spop %519 }
 0x486   :  { %s417_s22 = smul.f32 0.125, %s520_s1 }
 0x488   :  { %s437_s25 = smul.f32 0.5, %s417_s22 }
 0x48a   :  { %s522_s23 = spop %521 }
 0x48b   :  { %s436_s24 = smul.f32 0.125, %s522_s23 }
 0x48d   :  { %s438_s26 = smul.f32 0.5, %s436_s24 }
 0x48f   :  { %s439_s27 = sadd.f32 %s438_s26, %s437_s25 }
 0x491   :  { %441 = sst [smem:[#allocation2]] %s439_s27 }
 0x492   :  { %449 = dma.smem_to_hbm %s558_s28, 16, %s659_s5, [#allocation3]  }
 0x493   :  { %554 = dma.done.wait [#allocation3], 16  }
 0x494   :  { %555 = vsyncadd [#allocation3], 4294967280 }
 0x495   :  { %457 = sfence }
 0x496   :  { %458 = vsyncpa [#allocation3], 1 }

</bundles_post_ra>
